<compile_context>
chip_gen: v5e
topology: v5e:2x2
jax: 0.10.0
libtpu: 0.0.40
codegen_flags: <defaults>
</compile_context>

<pallas_src>
import functools

import jax
import jax.numpy as jnp
import numpy as np
from jax.experimental import pallas as pl
from jax.experimental.pallas import tpu as pltpu


def _round_up(x, m):
    return (x + m - 1) // m * m


def _sepconv_kernel(x_ref, wft_ref, o_ref, col_ref, *, kh_size, kw_size,
                    dilation, c_in, wp, w_out, group_rows, n_groups):
    """One grid step == one batch image.

    x_ref  : (1, Cin, L)        padded image, spatial flattened row-major,
                                L = (Hp + extra) * Wp (flat axis on lanes).
    wft_ref: (Cout, K)          fused weight, row k = (kh*KW + kw)*Cin + ci.
    o_ref  : (1, Cout, Ho*Wo)   channel-major flattened output.
    col_ref: (K, GR*Wp) f32     VMEM scratch: im2col block for one row-group.
    """
    wft = wft_ref[...].astype(jnp.float32)          # (Cout, K), loaded once
    m = group_rows * wp

    for g in range(n_groups):                       # static unroll
        r0 = g * group_rows

        # Build the (K, GR*Wp) column block: each tap is ONE contiguous lane
        # slice of the flattened image (row-wrap trick) stored at its K rows.
        for kh in range(kh_size):
            for kw in range(kw_size):
                k = kh * kw_size + kw
                start = (r0 + kh * dilation) * wp + kw * dilation
                col_ref[k * c_in:(k + 1) * c_in, :] = (
                    x_ref[0, :, start:start + m].astype(jnp.float32))

        # One fused MXU matmul: (Cout, K) @ (K, GR*Wp) -> (Cout, GR*Wp).
        out = jnp.dot(wft, col_ref[...], preferred_element_type=jnp.float32)

        # Crop the (Wp - Wo) wrap-around columns per output row and store.
        for t in range(group_rows):
            o_ref[0, :, (r0 + t) * w_out:(r0 + t + 1) * w_out] = (
                out[:, t * wp:t * wp + w_out].astype(o_ref.dtype))


def _pick_group_rows(h1, wp, k_dim, budget_bytes=2 << 20):
    """Largest divisor of h1 whose im2col scratch stays within the budget."""
    best = 1
    for gr in range(1, h1 + 1):
        if h1 % gr:
            continue
        scratch = _round_up(k_dim, 8) * _round_up(gr * wp, 128) * 4
        if scratch <= budget_bytes:
            best = gr
    return best


def separable_conv2d(x_nchw, w_depthwise, w_pointwise, *, stride=1, padding=0,
                     dilation=1, group_rows=None):
    """Forward pass matching PyTorch SeparableConv2d (bias=False).

    x_nchw      : (N, Cin, H, W)
    w_depthwise : (Cin, 1, KH, KW)   -- nn.Conv2d(groups=Cin) weight
    w_pointwise : (Cout, Cin, 1, 1)  -- nn.Conv2d 1x1 weight
    returns     : (N, Cout, Ho, Wo)
    """
    n, c_in, h, w = x_nchw.shape
    c_in_w, one, kh_size, kw_size = w_depthwise.shape
    assert c_in_w == c_in and one == 1
    c_out = w_pointwise.shape[0]
    assert w_pointwise.shape[1] == c_in

    hp, wp = h + 2 * padding, w + 2 * padding
    # Dense (stride-1) conv extents; stride>1 is handled by subsampling below.
    h1 = hp - dilation * (kh_size - 1)
    w1 = wp - dilation * (kw_size - 1)
    assert h1 > 0 and w1 > 0

    # Input prep: single jnp.pad (channel-first kept -> no transpose pass),
    # then a *free* reshape flattening the padded plane onto the lane axis.
    # `extra` bottom rows keep the last row-group's wrap-around reads in range.
    tail = dilation * (kw_size - 1)
    extra = -(-tail // wp) if tail else 0
    x_pad = jnp.pad(x_nchw, ((0, 0), (0, 0),
                             (padding, padding + extra), (padding, padding)))
    length = (hp + extra) * wp
    x_flat = x_pad.reshape(n, c_in, length)

    # Fused weight wfT[co, (kh*KW+kw)*Cin + ci] = dw[ci,kh,kw] * pw[co,ci].
    dw = w_depthwise[:, 0, :, :].astype(jnp.float32)            # (Cin, KH, KW)
    pw = w_pointwise[:, :, 0, 0].astype(jnp.float32)            # (Cout, Cin)
    k_dim = kh_size * kw_size * c_in
    wft = (pw[:, None, None, :] *
           jnp.transpose(dw, (1, 2, 0))[None]).reshape(c_out, k_dim)

    if group_rows is None:
        group_rows = _pick_group_rows(h1, wp, k_dim)
    assert h1 % group_rows == 0, "group_rows must divide the dense out height"
    n_groups = h1 // group_rows
    m = group_rows * wp

    kernel = functools.partial(
        _sepconv_kernel, kh_size=kh_size, kw_size=kw_size, dilation=dilation,
        c_in=c_in, wp=wp, w_out=w1, group_rows=group_rows, n_groups=n_groups)

    # Resident-footprint-derived VMEM limit (double-buffered blocks + scratch),
    # with headroom, clamped to a v7x-safe ceiling.
    vmem_bytes = 2 * (
        2 * _round_up(c_in, 8) * _round_up(length, 128) * 4       # input bufs
        + 2 * _round_up(c_out, 8) * _round_up(k_dim, 128) * 4     # weight bufs
        + 2 * _round_up(c_out, 8) * _round_up(h1 * w1, 128) * 4   # output bufs
        + _round_up(k_dim, 8) * _round_up(m, 128) * 4)            # im2col
    vmem_bytes = int(min(max(vmem_bytes, 4 << 20), 48 << 20))

    out_flat = pl.pallas_call(
        kernel,
        out_shape=jax.ShapeDtypeStruct((n, c_out, h1 * w1), x_nchw.dtype),
        grid_spec=pltpu.PrefetchScalarGridSpec(
            num_scalar_prefetch=0,
            grid=(n,),
            in_specs=[
                pl.BlockSpec((1, c_in, length), lambda b: (b, 0, 0)),
                pl.BlockSpec((c_out, k_dim), lambda b: (0, 0)),
            ],
            out_specs=pl.BlockSpec((1, c_out, h1 * w1), lambda b: (b, 0, 0)),
            scratch_shapes=[pltpu.VMEM((k_dim, m), jnp.float32)],
        ),
        compiler_params=pltpu.CompilerParams(
            dimension_semantics=("parallel",),
            vmem_limit_bytes=vmem_bytes),
    )(x_flat, wft)

    y = out_flat.reshape(n, c_out, h1, w1)     # free reshape, already NCHW
    if stride != 1:
        y = y[:, :, ::stride, ::stride]        # dense result subsampled
    return y


def _reference(x_nchw, w_depthwise, w_pointwise, *, stride, padding, dilation):
    """Pure-JAX reference (mirrors the two nn.Conv2d calls)."""
    c_in = x_nchw.shape[1]
    y = jax.lax.conv_general_dilated(
        x_nchw, w_depthwise,
        window_strides=(stride, stride),
        padding=[(padding, padding), (padding, padding)],
        rhs_dilation=(dilation, dilation),
        dimension_numbers=("NCHW", "OIHW", "NCHW"),
        feature_group_count=c_in,
    )
    y = jax.lax.conv_general_dilated(
        y, w_pointwise,
        window_strides=(1, 1),
        padding=[(0, 0), (0, 0)],
        dimension_numbers=("NCHW", "OIHW", "NCHW"),
    )
    return y


if __name__ == "__main__":
    # Module hyper-params: in_channels=4, out_channels=8, kernel_size=3,
    # bias=False; stride/padding/dilation varied below.
    N, C_IN, H, W = 2, 4, 16, 16
    C_OUT, K = 8, 3

    key = jax.random.PRNGKey(0)
    kx, kd, kp = jax.random.split(key, 3)
    x = jax.random.normal(kx, (N, C_IN, H, W), dtype=jnp.float32)
    w_dw = jax.random.normal(kd, (C_IN, 1, K, K), dtype=jnp.float32) * 0.1
    w_pw = jax.random.normal(kp, (C_OUT, C_IN, 1, 1), dtype=jnp.float32) * 0.1

    configs = [
        dict(stride=1, padding=1, dilation=1, group_rows=None),  # default
        dict(stride=1, padding=1, dilation=1, group_rows=4),     # multi-group
        dict(stride=2, padding=1, dilation=1, group_rows=None),  # strided
        dict(stride=1, padding=2, dilation=2, group_rows=None),  # dilated
    ]
    for cfg in configs:
        ref = _reference(x, w_dw, w_pw, stride=cfg["stride"],
                         padding=cfg["padding"], dilation=cfg["dilation"])
        out = jax.block_until_ready(separable_conv2d(x, w_dw, w_pw, **cfg))
        np.testing.assert_allclose(np.asarray(out), np.asarray(ref),
                                   rtol=1e-5, atol=1e-5)

    print("KERNEL_OK")
</pallas_src>

<mosaic_0001>
module attributes {stable_mosaic.version = 11 : i64} {
  func.func @_sepconv_kernel(%arg0: i32, %arg1: memref<1x4x342xf32, #tpu.memory_space<vmem>>, %arg2: memref<8x36xf32, #tpu.memory_space<vmem>>, %arg3: memref<1x8x256xf32, #tpu.memory_space<vmem>>, %arg4: memref<36x288xf32, #tpu.memory_space<vmem>>) attributes {dimension_semantics = [#tpu.dimension_semantics<parallel>], iteration_bounds = array<i64: 2>, scalar_prefetch = 0 : i64, scratch_operands = 1 : i64, tpu.core_type = #tpu.core_type<tc>, window_params = [{transform_indices = @transform_0, window_bounds = array<i64: 1, 4, 342>}, {pipeline_mode = #tpu.pipeline_mode<synchronous>, transform_indices = @transform_1, window_bounds = array<i64: 8, 36>}, {transform_indices = @transform_2, window_bounds = array<i64: 1, 8, 256>}]} {
    %c0 = arith.constant 0 : index
    %c0_0 = arith.constant 0 : index
    %0 = vector.load %arg2[%c0, %c0_0] : memref<8x36xf32, #tpu.memory_space<vmem>>, vector<8x36xf32>
    %c0_1 = arith.constant 0 : index
    %c0_2 = arith.constant 0 : index
    %c0_3 = arith.constant 0 : index
    %1 = vector.load %arg1[%c0_1, %c0_2, %c0_3] : memref<1x4x342xf32, #tpu.memory_space<vmem>>, vector<1x4x288xf32>
    %2 = vector.shape_cast %1 : vector<1x4x288xf32> to vector<4x288xf32>
    %c0_4 = arith.constant 0 : index
    %c0_5 = arith.constant 0 : index
    %3 = vector.load %arg4[%c0_4, %c0_5] : memref<36x288xf32, #tpu.memory_space<vmem>>, vector<4x288xf32>
    tpu.vector_store %arg4[%c0_4, %c0_5], %2 {strides = array<i32>} : memref<36x288xf32, #tpu.memory_space<vmem>>, vector<4x288xf32>,
    %c0_6 = arith.constant 0 : index
    %c0_7 = arith.constant 0 : index
    %c1 = arith.constant 1 : index
    %4 = vector.load %arg1[%c0_6, %c0_7, %c1] : memref<1x4x342xf32, #tpu.memory_space<vmem>>, vector<1x4x288xf32>
    %5 = vector.shape_cast %4 : vector<1x4x288xf32> to vector<4x288xf32>
    %c4 = arith.constant 4 : index
    %c0_8 = arith.constant 0 : index
    %6 = vector.load %arg4[%c4, %c0_8] : memref<36x288xf32, #tpu.memory_space<vmem>>, vector<4x288xf32>
    tpu.vector_store %arg4[%c4, %c0_8], %5 {strides = array<i32>} : memref<36x288xf32, #tpu.memory_space<vmem>>, vector<4x288xf32>,
    %c0_9 = arith.constant 0 : index
    %c0_10 = arith.constant 0 : index
    %c2 = arith.constant 2 : index
    %7 = vector.load %arg1[%c0_9, %c0_10, %c2] : memref<1x4x342xf32, #tpu.memory_space<vmem>>, vector<1x4x288xf32>
    %8 = vector.shape_cast %7 : vector<1x4x288xf32> to vector<4x288xf32>
    %c8 = arith.constant 8 : index
    %c0_11 = arith.constant 0 : index
    %9 = vector.load %arg4[%c8, %c0_11] : memref<36x288xf32, #tpu.memory_space<vmem>>, vector<4x288xf32>
    tpu.vector_store %arg4[%c8, %c0_11], %8 {strides = array<i32>} : memref<36x288xf32, #tpu.memory_space<vmem>>, vector<4x288xf32>,
    %c0_12 = arith.constant 0 : index
    %c0_13 = arith.constant 0 : index
    %c18 = arith.constant 18 : index
    %10 = vector.load %arg1[%c0_12, %c0_13, %c18] : memref<1x4x342xf32, #tpu.memory_space<vmem>>, vector<1x4x288xf32>
    %11 = vector.shape_cast %10 : vector<1x4x288xf32> to vector<4x288xf32>
    %c12 = arith.constant 12 : index
    %c0_14 = arith.constant 0 : index
    %12 = vector.load %arg4[%c12, %c0_14] : memref<36x288xf32, #tpu.memory_space<vmem>>, vector<4x288xf32>
    tpu.vector_store %arg4[%c12, %c0_14], %11 {strides = array<i32>} : memref<36x288xf32, #tpu.memory_space<vmem>>, vector<4x288xf32>,
    %c0_15 = arith.constant 0 : index
    %c0_16 = arith.constant 0 : index
    %c19 = arith.constant 19 : index
    %13 = vector.load %arg1[%c0_15, %c0_16, %c19] : memref<1x4x342xf32, #tpu.memory_space<vmem>>, vector<1x4x288xf32>
    %14 = vector.shape_cast %13 : vector<1x4x288xf32> to vector<4x288xf32>
    %c16 = arith.constant 16 : index
    %c0_17 = arith.constant 0 : index
    %15 = vector.load %arg4[%c16, %c0_17] : memref<36x288xf32, #tpu.memory_space<vmem>>, vector<4x288xf32>
    tpu.vector_store %arg4[%c16, %c0_17], %14 {strides = array<i32>} : memref<36x288xf32, #tpu.memory_space<vmem>>, vector<4x288xf32>,
    %c0_18 = arith.constant 0 : index
    %c0_19 = arith.constant 0 : index
    %c20 = arith.constant 20 : index
    %16 = vector.load %arg1[%c0_18, %c0_19, %c20] : memref<1x4x342xf32, #tpu.memory_space<vmem>>, vector<1x4x288xf32>
    %17 = vector.shape_cast %16 : vector<1x4x288xf32> to vector<4x288xf32>
    %c20_20 = arith.constant 20 : index
    %c0_21 = arith.constant 0 : index
    %18 = vector.load %arg4[%c20_20, %c0_21] : memref<36x288xf32, #tpu.memory_space<vmem>>, vector<4x288xf32>
    tpu.vector_store %arg4[%c20_20, %c0_21], %17 {strides = array<i32>} : memref<36x288xf32, #tpu.memory_space<vmem>>, vector<4x288xf32>,
    %c0_22 = arith.constant 0 : index
    %c0_23 = arith.constant 0 : index
    %c36 = arith.constant 36 : index
    %19 = vector.load %arg1[%c0_22, %c0_23, %c36] : memref<1x4x342xf32, #tpu.memory_space<vmem>>, vector<1x4x288xf32>
    %20 = vector.shape_cast %19 : vector<1x4x288xf32> to vector<4x288xf32>
    %c24 = arith.constant 24 : index
    %c0_24 = arith.constant 0 : index
    %21 = vector.load %arg4[%c24, %c0_24] : memref<36x288xf32, #tpu.memory_space<vmem>>, vector<4x288xf32>
    tpu.vector_store %arg4[%c24, %c0_24], %20 {strides = array<i32>} : memref<36x288xf32, #tpu.memory_space<vmem>>, vector<4x288xf32>,
    %c0_25 = arith.constant 0 : index
    %c0_26 = arith.constant 0 : index
    %c37 = arith.constant 37 : index
    %22 = vector.load %arg1[%c0_25, %c0_26, %c37] : memref<1x4x342xf32, #tpu.memory_space<vmem>>, vector<1x4x288xf32>
    %23 = vector.shape_cast %22 : vector<1x4x288xf32> to vector<4x288xf32>
    %c28 = arith.constant 28 : index
    %c0_27 = arith.constant 0 : index
    %24 = vector.load %arg4[%c28, %c0_27] : memref<36x288xf32, #tpu.memory_space<vmem>>, vector<4x288xf32>
    tpu.vector_store %arg4[%c28, %c0_27], %23 {strides = array<i32>} : memref<36x288xf32, #tpu.memory_space<vmem>>, vector<4x288xf32>,
    %c0_28 = arith.constant 0 : index
    %c0_29 = arith.constant 0 : index
    %c38 = arith.constant 38 : index
    %25 = vector.load %arg1[%c0_28, %c0_29, %c38] : memref<1x4x342xf32, #tpu.memory_space<vmem>>, vector<1x4x288xf32>
    %26 = vector.shape_cast %25 : vector<1x4x288xf32> to vector<4x288xf32>
    %c32 = arith.constant 32 : index
    %c0_30 = arith.constant 0 : index
    %27 = vector.load %arg4[%c32, %c0_30] : memref<36x288xf32, #tpu.memory_space<vmem>>, vector<4x288xf32>
    tpu.vector_store %arg4[%c32, %c0_30], %26 {strides = array<i32>} : memref<36x288xf32, #tpu.memory_space<vmem>>, vector<4x288xf32>,
    %c0_31 = arith.constant 0 : index
    %c0_32 = arith.constant 0 : index
    %28 = vector.load %arg4[%c0_31, %c0_32] : memref<36x288xf32, #tpu.memory_space<vmem>>, vector<36x288xf32>
    %cst = arith.constant dense<0.000000e+00> : vector<8x288xf32>
    %29 = tpu.matmul %0, %28, %cst {dimension_numbers = #tpu.dot_dimension_numbers<[1], [0], [0], [1], [0, 0, 1, 1], [], []>} : vector<8x36xf32>, vector<36x288xf32>, vector<8x288xf32> -> vector<8x288xf32>
    %30 = vector.extract_strided_slice %29 {offsets = [0, 0], sizes = [8, 16], strides = [1, 1]} : vector<8x288xf32> to vector<8x16xf32>
    %c0_33 = arith.constant 0 : index
    %c0_34 = arith.constant 0 : index
    %c0_35 = arith.constant 0 : index
    %31 = vector.load %arg3[%c0_33, %c0_34, %c0_35] : memref<1x8x256xf32, #tpu.memory_space<vmem>>, vector<1x8x16xf32>
    %32 = vector.shape_cast %31 : vector<1x8x16xf32> to vector<8x16xf32>
    %33 = vector.shape_cast %30 : vector<8x16xf32> to vector<1x8x16xf32>
    tpu.vector_store %arg3[%c0_33, %c0_34, %c0_35], %33 {strides = array<i32>} : memref<1x8x256xf32, #tpu.memory_space<vmem>>, vector<1x8x16xf32>,
    %34 = vector.extract_strided_slice %29 {offsets = [0, 18], sizes = [8, 16], strides = [1, 1]} : vector<8x288xf32> to vector<8x16xf32>
    %c0_36 = arith.constant 0 : index
    %c0_37 = arith.constant 0 : index
    %c16_38 = arith.constant 16 : index
    %35 = vector.load %arg3[%c0_36, %c0_37, %c16_38] : memref<1x8x256xf32, #tpu.memory_space<vmem>>, vector<1x8x16xf32>
    %36 = vector.shape_cast %35 : vector<1x8x16xf32> to vector<8x16xf32>
    %37 = vector.shape_cast %34 : vector<8x16xf32> to vector<1x8x16xf32>
    tpu.vector_store %arg3[%c0_36, %c0_37, %c16_38], %37 {strides = array<i32>} : memref<1x8x256xf32, #tpu.memory_space<vmem>>, vector<1x8x16xf32>,
    %38 = vector.extract_strided_slice %29 {offsets = [0, 36], sizes = [8, 16], strides = [1, 1]} : vector<8x288xf32> to vector<8x16xf32>
    %c0_39 = arith.constant 0 : index
    %c0_40 = arith.constant 0 : index
    %c32_41 = arith.constant 32 : index
    %39 = vector.load %arg3[%c0_39, %c0_40, %c32_41] : memref<1x8x256xf32, #tpu.memory_space<vmem>>, vector<1x8x16xf32>
    %40 = vector.shape_cast %39 : vector<1x8x16xf32> to vector<8x16xf32>
    %41 = vector.shape_cast %38 : vector<8x16xf32> to vector<1x8x16xf32>
    tpu.vector_store %arg3[%c0_39, %c0_40, %c32_41], %41 {strides = array<i32>} : memref<1x8x256xf32, #tpu.memory_space<vmem>>, vector<1x8x16xf32>,
    %42 = vector.extract_strided_slice %29 {offsets = [0, 54], sizes = [8, 16], strides = [1, 1]} : vector<8x288xf32> to vector<8x16xf32>
    %c0_42 = arith.constant 0 : index
    %c0_43 = arith.constant 0 : index
    %c48 = arith.constant 48 : index
    %43 = vector.load %arg3[%c0_42, %c0_43, %c48] : memref<1x8x256xf32, #tpu.memory_space<vmem>>, vector<1x8x16xf32>
    %44 = vector.shape_cast %43 : vector<1x8x16xf32> to vector<8x16xf32>
    %45 = vector.shape_cast %42 : vector<8x16xf32> to vector<1x8x16xf32>
    tpu.vector_store %arg3[%c0_42, %c0_43, %c48], %45 {strides = array<i32>} : memref<1x8x256xf32, #tpu.memory_space<vmem>>, vector<1x8x16xf32>,
    %46 = vector.extract_strided_slice %29 {offsets = [0, 72], sizes = [8, 16], strides = [1, 1]} : vector<8x288xf32> to vector<8x16xf32>
    %c0_44 = arith.constant 0 : index
    %c0_45 = arith.constant 0 : index
    %c64 = arith.constant 64 : index
    %47 = vector.load %arg3[%c0_44, %c0_45, %c64] : memref<1x8x256xf32, #tpu.memory_space<vmem>>, vector<1x8x16xf32>
    %48 = vector.shape_cast %47 : vector<1x8x16xf32> to vector<8x16xf32>
    %49 = vector.shape_cast %46 : vector<8x16xf32> to vector<1x8x16xf32>
    tpu.vector_store %arg3[%c0_44, %c0_45, %c64], %49 {strides = array<i32>} : memref<1x8x256xf32, #tpu.memory_space<vmem>>, vector<1x8x16xf32>,
    %50 = vector.extract_strided_slice %29 {offsets = [0, 90], sizes = [8, 16], strides = [1, 1]} : vector<8x288xf32> to vector<8x16xf32>
    %c0_46 = arith.constant 0 : index
    %c0_47 = arith.constant 0 : index
    %c80 = arith.constant 80 : index
    %51 = vector.load %arg3[%c0_46, %c0_47, %c80] : memref<1x8x256xf32, #tpu.memory_space<vmem>>, vector<1x8x16xf32>
    %52 = vector.shape_cast %51 : vector<1x8x16xf32> to vector<8x16xf32>
    %53 = vector.shape_cast %50 : vector<8x16xf32> to vector<1x8x16xf32>
    tpu.vector_store %arg3[%c0_46, %c0_47, %c80], %53 {strides = array<i32>} : memref<1x8x256xf32, #tpu.memory_space<vmem>>, vector<1x8x16xf32>,
    %54 = vector.extract_strided_slice %29 {offsets = [0, 108], sizes = [8, 16], strides = [1, 1]} : vector<8x288xf32> to vector<8x16xf32>
    %c0_48 = arith.constant 0 : index
    %c0_49 = arith.constant 0 : index
    %c96 = arith.constant 96 : index
    %55 = vector.load %arg3[%c0_48, %c0_49, %c96] : memref<1x8x256xf32, #tpu.memory_space<vmem>>, vector<1x8x16xf32>
    %56 = vector.shape_cast %55 : vector<1x8x16xf32> to vector<8x16xf32>
    %57 = vector.shape_cast %54 : vector<8x16xf32> to vector<1x8x16xf32>
    tpu.vector_store %arg3[%c0_48, %c0_49, %c96], %57 {strides = array<i32>} : memref<1x8x256xf32, #tpu.memory_space<vmem>>, vector<1x8x16xf32>,
    %58 = vector.extract_strided_slice %29 {offsets = [0, 126], sizes = [8, 16], strides = [1, 1]} : vector<8x288xf32> to vector<8x16xf32>
    %c0_50 = arith.constant 0 : index
    %c0_51 = arith.constant 0 : index
    %c112 = arith.constant 112 : index
    %59 = vector.load %arg3[%c0_50, %c0_51, %c112] : memref<1x8x256xf32, #tpu.memory_space<vmem>>, vector<1x8x16xf32>
    %60 = vector.shape_cast %59 : vector<1x8x16xf32> to vector<8x16xf32>
    %61 = vector.shape_cast %58 : vector<8x16xf32> to vector<1x8x16xf32>
    tpu.vector_store %arg3[%c0_50, %c0_51, %c112], %61 {strides = array<i32>} : memref<1x8x256xf32, #tpu.memory_space<vmem>>, vector<1x8x16xf32>,
    %62 = vector.extract_strided_slice %29 {offsets = [0, 144], sizes = [8, 16], strides = [1, 1]} : vector<8x288xf32> to vector<8x16xf32>
    %c0_52 = arith.constant 0 : index
    %c0_53 = arith.constant 0 : index
    %c128 = arith.constant 128 : index
    %63 = vector.load %arg3[%c0_52, %c0_53, %c128] : memref<1x8x256xf32, #tpu.memory_space<vmem>>, vector<1x8x16xf32>
    %64 = vector.shape_cast %63 : vector<1x8x16xf32> to vector<8x16xf32>
    %65 = vector.shape_cast %62 : vector<8x16xf32> to vector<1x8x16xf32>
    tpu.vector_store %arg3[%c0_52, %c0_53, %c128], %65 {strides = array<i32>} : memref<1x8x256xf32, #tpu.memory_space<vmem>>, vector<1x8x16xf32>,
    %66 = vector.extract_strided_slice %29 {offsets = [0, 162], sizes = [8, 16], strides = [1, 1]} : vector<8x288xf32> to vector<8x16xf32>
    %c0_54 = arith.constant 0 : index
    %c0_55 = arith.constant 0 : index
    %c144 = arith.constant 144 : index
    %67 = vector.load %arg3[%c0_54, %c0_55, %c144] : memref<1x8x256xf32, #tpu.memory_space<vmem>>, vector<1x8x16xf32>
    %68 = vector.shape_cast %67 : vector<1x8x16xf32> to vector<8x16xf32>
    %69 = vector.shape_cast %66 : vector<8x16xf32> to vector<1x8x16xf32>
    tpu.vector_store %arg3[%c0_54, %c0_55, %c144], %69 {strides = array<i32>} : memref<1x8x256xf32, #tpu.memory_space<vmem>>, vector<1x8x16xf32>,
    %70 = vector.extract_strided_slice %29 {offsets = [0, 180], sizes = [8, 16], strides = [1, 1]} : vector<8x288xf32> to vector<8x16xf32>
    %c0_56 = arith.constant 0 : index
    %c0_57 = arith.constant 0 : index
    %c160 = arith.constant 160 : index
    %71 = vector.load %arg3[%c0_56, %c0_57, %c160] : memref<1x8x256xf32, #tpu.memory_space<vmem>>, vector<1x8x16xf32>
    %72 = vector.shape_cast %71 : vector<1x8x16xf32> to vector<8x16xf32>
    %73 = vector.shape_cast %70 : vector<8x16xf32> to vector<1x8x16xf32>
    tpu.vector_store %arg3[%c0_56, %c0_57, %c160], %73 {strides = array<i32>} : memref<1x8x256xf32, #tpu.memory_space<vmem>>, vector<1x8x16xf32>,
    %74 = vector.extract_strided_slice %29 {offsets = [0, 198], sizes = [8, 16], strides = [1, 1]} : vector<8x288xf32> to vector<8x16xf32>
    %c0_58 = arith.constant 0 : index
    %c0_59 = arith.constant 0 : index
    %c176 = arith.constant 176 : index
    %75 = vector.load %arg3[%c0_58, %c0_59, %c176] : memref<1x8x256xf32, #tpu.memory_space<vmem>>, vector<1x8x16xf32>
    %76 = vector.shape_cast %75 : vector<1x8x16xf32> to vector<8x16xf32>
    %77 = vector.shape_cast %74 : vector<8x16xf32> to vector<1x8x16xf32>
    tpu.vector_store %arg3[%c0_58, %c0_59, %c176], %77 {strides = array<i32>} : memref<1x8x256xf32, #tpu.memory_space<vmem>>, vector<1x8x16xf32>,
    %78 = vector.extract_strided_slice %29 {offsets = [0, 216], sizes = [8, 16], strides = [1, 1]} : vector<8x288xf32> to vector<8x16xf32>
    %c0_60 = arith.constant 0 : index
    %c0_61 = arith.constant 0 : index
    %c192 = arith.constant 192 : index
    %79 = vector.load %arg3[%c0_60, %c0_61, %c192] : memref<1x8x256xf32, #tpu.memory_space<vmem>>, vector<1x8x16xf32>
    %80 = vector.shape_cast %79 : vector<1x8x16xf32> to vector<8x16xf32>
    %81 = vector.shape_cast %78 : vector<8x16xf32> to vector<1x8x16xf32>
    tpu.vector_store %arg3[%c0_60, %c0_61, %c192], %81 {strides = array<i32>} : memref<1x8x256xf32, #tpu.memory_space<vmem>>, vector<1x8x16xf32>,
    %82 = vector.extract_strided_slice %29 {offsets = [0, 234], sizes = [8, 16], strides = [1, 1]} : vector<8x288xf32> to vector<8x16xf32>
    %c0_62 = arith.constant 0 : index
    %c0_63 = arith.constant 0 : index
    %c208 = arith.constant 208 : index
    %83 = vector.load %arg3[%c0_62, %c0_63, %c208] : memref<1x8x256xf32, #tpu.memory_space<vmem>>, vector<1x8x16xf32>
    %84 = vector.shape_cast %83 : vector<1x8x16xf32> to vector<8x16xf32>
    %85 = vector.shape_cast %82 : vector<8x16xf32> to vector<1x8x16xf32>
    tpu.vector_store %arg3[%c0_62, %c0_63, %c208], %85 {strides = array<i32>} : memref<1x8x256xf32, #tpu.memory_space<vmem>>, vector<1x8x16xf32>,
    %86 = vector.extract_strided_slice %29 {offsets = [0, 252], sizes = [8, 16], strides = [1, 1]} : vector<8x288xf32> to vector<8x16xf32>
    %c0_64 = arith.constant 0 : index
    %c0_65 = arith.constant 0 : index
    %c224 = arith.constant 224 : index
    %87 = vector.load %arg3[%c0_64, %c0_65, %c224] : memref<1x8x256xf32, #tpu.memory_space<vmem>>, vector<1x8x16xf32>
    %88 = vector.shape_cast %87 : vector<1x8x16xf32> to vector<8x16xf32>
    %89 = vector.shape_cast %86 : vector<8x16xf32> to vector<1x8x16xf32>
    tpu.vector_store %arg3[%c0_64, %c0_65, %c224], %89 {strides = array<i32>} : memref<1x8x256xf32, #tpu.memory_space<vmem>>, vector<1x8x16xf32>,
    %90 = vector.extract_strided_slice %29 {offsets = [0, 270], sizes = [8, 16], strides = [1, 1]} : vector<8x288xf32> to vector<8x16xf32>
    %c0_66 = arith.constant 0 : index
    %c0_67 = arith.constant 0 : index
    %c240 = arith.constant 240 : index
    %91 = vector.load %arg3[%c0_66, %c0_67, %c240] : memref<1x8x256xf32, #tpu.memory_space<vmem>>, vector<1x8x16xf32>
    %92 = vector.shape_cast %91 : vector<1x8x16xf32> to vector<8x16xf32>
    %93 = vector.shape_cast %90 : vector<8x16xf32> to vector<1x8x16xf32>
    tpu.vector_store %arg3[%c0_66, %c0_67, %c240], %93 {strides = array<i32>} : memref<1x8x256xf32, #tpu.memory_space<vmem>>, vector<1x8x16xf32>,
    return
  }
  func.func @transform_0(%arg0: i32) -> (i32, i32, i32) {
    %c0_i32 = arith.constant 0 : i32
    %c0_i32_0 = arith.constant 0 : i32
    %c0_i32_1 = arith.constant 0 : i32
    return %arg0, %c0_i32, %c0_i32_0 : i32, i32, i32
  }
  func.func @transform_1(%arg0: i32) -> (i32, i32) {
    %c0_i32 = arith.constant 0 : i32
    %c0_i32_0 = arith.constant 0 : i32
    %c0_i32_1 = arith.constant 0 : i32
    return %c0_i32, %c0_i32_0 : i32, i32
  }
  func.func @transform_2(%arg0: i32) -> (i32, i32, i32) {
    %c0_i32 = arith.constant 0 : i32
    %c0_i32_0 = arith.constant 0 : i32
    %c0_i32_1 = arith.constant 0 : i32
    return %arg0, %c0_i32, %c0_i32_0 : i32, i32, i32
  }
}

</mosaic_0001>

<bundles_post_ra>
// kernel: tpu_custom_call.1
= control target key start
LH: loop header
LB: loop body
LE: loop exit
PB: predicated region body
PF: predicated region fallthrough
CT: control target
= control target key end

     0   :  { %7 = vsyncpa [#allocation4], 0  ;;  %s1157_s0 = inlined_call_operand.hbm [shape: f32[2,4,342], index: 0, kind: input, shape index: {}]   ;;  %s1158_s1 = inlined_call_operand.hbm [shape: f32[8,36], index: 1, kind: input, shape index: {}]   ;;  %s1159_s2 = inlined_call_operand.hbm [shape: f32[2,8,256], index: 2, kind: output, shape index: {}]  }
   0x1   :  { %9 = vsyncpa [#allocation4 + $0x1], 0 }
   0x2   :  { %10 = vsyncpa [#allocation7], 0 }
   0x3   :  { %11 = vsyncpa [#allocation5], 0 }
   0x4   :  { %13 = vsyncpa [#allocation5 + $0x1], 0  ;;  %s934_s9 = smov 0   ;;  %s936_s10 = smov 0  }
   0x5   :  { %s938_s11 = smov 0   ;;  %s940_s12 = smov 0  }
   0x6 LB: > { %s955_s13 = sadd.s32 4294967295, %s896_s12   ;;  %s666_s14 = sadd.s32 4294967294, %s896_s12   ;;  %s896_s12 = sphi %s940_s12, %s1169_s12   ;;  %s892_s11 = sphi %s938_s11, %s1168_s11   ;;  %s888_s10 = sphi %s936_s10, %s1167_s10   ;;  %s884_s9 = sphi %s934_s9, %s1166_s9  }
   0x7   : > { %p39_p0 = scmp.ne.s32.totalorder %s888_s10, %s884_s9  ;;  %p40_p1 = scmp.eq.s32.totalorder %s955_s13, 0 }
   0x8   : > { %p84_p2 = scmp.eq.s32.totalorder %s955_s13, 1  ;;  %p90_p3 = scmp.eq.s32.totalorder %s666_s14, 1 }
   0x9   : > { %p964_p4 = por %p40_p1, %p39_p0  ;;  %p667_p5 = scmp.ge.s32.totalorder %s896_s12, 1 }
   0xa   : > { %p969_p6 = por %p90_p3, %p39_p0  ;;  %p97_p7 = scmp.lt.s32.totalorder %s896_s12, 3 }
   0xb   : > { %s109_s19 = sshll.u32 %s1158_s1, 4  ;;  %s898_s21 = smov [#allocation6]   ;;  %s110_s19 = int_to_ptr.hbm [resolvable:$true] %s109_s19 }
   0xc   : > { %p977_p8 = pnand %p667_p5, %p97_p7  ;;  %s111_s22 = sshll.u32 %s898_s21, 4  ;;  %s112_s22 = int_to_ptr.vmem [resolvable:$true] %s111_s22 }
   0xd   : > { %s987_s23 = sadd.s32 1, %s896_s12   ;;  %s26_s24 = sadd.s32 1, %s892_s11 }
   0xe   : > { %p697_p10 = pneg %p977_p8  ;;  %s23_s25 = ssub.s32 %s896_s12, %s987_s23 }
   0xf   : > { %p24_p12 = scmp.eq.s32.totalorder %s23_s25, 0  ;;  %p33_p13 = scmp.ne.s32.totalorder %s892_s11, %s888_s10 }
  0x10   : > { %p698_p11 = pnand %p697_p10, %p40_p1  ;;  %p34_p0 = scmp.eq.s32.totalorder %s896_s12, 0 }
  0x11   : > { %p710_p3 = scmp.lt.s32.totalorder %s896_s12, 2  ;;  %p1001_p7 = por %p84_p2, %p33_p13 }
  0x12   : > { %700 = dma.hbm_to_vmem [thread:$0]  (!%p698_p11), %s110_s19, 128, %s112_s22, [#allocation7]  }
  0x13   : > { %s997_s26 = scalar_select %p24_p12, %s892_s11, %s26_s24  }
  0x14   : > { %p35_p5 = por %p34_p0, %p33_p13  ;;  %s122_s28 = sand.u32 1, %s892_s11  }
  0x15   : > { %s687_s29 = smul.u32 12, %s896_s12  ;;  %s123_s17 = scalar_lea.sflag [#allocation4], %s122_s28 }
  0x16   : > { %s686_s30 = smul.u32 12, %s122_s28  ;;  %p1010_p10 = pnand %p710_p3, %p35_p5 }
  0x17   : > { %s131_s5 = scalar_lea.hbm %s1157_s0, %s687_s29  ;;  %s803_s24 = scalar_lea.hbm %s1157_s0, 24 }
  0x18   : > { %s133_s7 = sshll.u32 %s131_s5, 4  ;;  %s126_s8 = scalar_lea.vmem [#allocation3], %s686_s30  ;;  %s134_s7 = int_to_ptr.hbm [resolvable:$true] %s133_s7 }
  0x19   : > { %s135_s14 = sshll.u32 %s126_s8, 4  ;;  %s796_s18 = sshra.s32 %s134_s7, 4  ;;  %s136_s14 = int_to_ptr.vmem [resolvable:$true] %s135_s14  ;;  %s797_s18 = int_to_ptr.hbm [resolvable:$true] %s796_s18 }
  0x1a   : > { %s798_s19 = scalar_lea.hbm %s797_s18, 12  ;;  %p800_p11 = pneg %p1010_p10 }
  0x1b   : > { %p799_p2 = scmp.ne.s32.totalorder %s797_s18, %s798_s19  ;;  %p804_p0 = scmp.lt.s32.totalorder %s797_s18, %s1157_s0 }
  0x1c   : > { %p805_p3 = scmp.lt.s32.totalorder %s803_s24, %s798_s19 }
  0x1d   : > { %p801_p12 = pnand %p800_p11, %p799_p2 }
  0x1e   : > { %p806_p5 = por %p805_p3, %p804_p0 }
  0x1f   : > { %p802_p13 = pneg %p801_p12 }
  0x21   : > { %p807_p9 = pnand %p806_p5, %p802_p13 }
  0x23   : > { %810 = shalt.err (!%p807_p9)
}
  0x24   : > { %704 = dma.hbm_to_vmem [thread:$0]  (!%p1010_p10), %s134_s7, 192, %s136_s14, %s123_s17  }
  0x25   : > { %144 = sbr.rel (%p977_p8) target bundleno = 546 (0x222), region = 28  ;;  %s1027_s28 = sand.u32 (!%p977_p8), 1, %s888_s10  }
  0x26   : > { %s688_s30 = smul.u32 (!%p977_p8), 12, %s1027_s28  ;;  %s147_s3 = scalar_lea.sflag (!%p977_p8), [#allocation4], %s1027_s28 }
  0x28   : > { %s1031_s4 = scalar_lea.vmem (!%p977_p8), [#allocation3], %s688_s30 }
  0x2a   : > { %871 = dma.done.wait (%p964_p4), %s147_s3, 192  }
  0x2b   : > { %873 = vsyncadd (%p964_p4), %s147_s3, 4294967104 }
  0x2c   : > { %875 = dma.done.wait (%p40_p1), [#allocation7], 128  }
  0x2d   : > { %877 = vsyncadd (%p40_p1), [#allocation7], 4294967168  ;;  %v179_v0 = vld [vmem:[%s1031_s4 + $0x8] sm:$0xf]  ;;  %v1043_v1 = vld [vmem:[%s1031_s4] sm:$0xff]  ;;  %s899_s15 = smov 126  }
  0x2e   : > { %184 = vst [vmem:[#allocation1 + $0x10] ss:$2 sm:$0xff] %v179_v0  ;;  %v196_v2 = vld [vmem:[%s1031_s4 + $0x8] sm:$0xf]  ;;  %s900_s20 = smov 110   ;;  %s901_s5 = smov 109  }
  0x2f   : > { %182 = vst [vmem:[#allocation1] ss:$2 sm:$0xff] %v1043_v1  ;;  %v223_v6 = vld [vmem:[%s1031_s4 + $0x8] sm:$0xf]  ;;  %s902_s6 = smov 108   ;;  %s903_s7 = smov 92  }
  0x30   : > { %v248_v10 = vld [vmem:[%s1031_s4 + $0x8] sm:$0xf]  ;;  %s904_s8 = smov 91   ;;  %s905_s14 = smov 90   ;;  %vm193_vm0 = vcmask 257024   ;;  %vm264_vm1 = vcmask 900096  }
  0x31   : > { %v274_v14 = vld [vmem:[%s1031_s4 + $0x8] sm:$0xf]  ;;  %s906_s17 = smov 127   ;;  %vm238_vm2 = vcmask 1031168   ;;  %vm220_vm3 = vcmask 261124   ;;  %vm315_vm4 = vcmask 883712  }
  0x32   : > { %v299_v18 = vld [vmem:[%s1031_s4 + $0x8] sm:$0xf]  ;;  %vm289_vm5 = vcmask 891904   ;;  %vm340_vm6 = vcmask 752640   ;;  %vm366_vm7 = vcmask 744448   ;;  %vm391_vm8 = vcmask 736256  }
  0x33   : > { %v325_v22 = vld [vmem:[%s1031_s4 + $0x8] sm:$0xf]  ;;  %vm419_vm9 = vcmask 1043456   ;;  %vm212_vm10 = vcmask 1039360   ;;  %vm415_vm11 = vcmask 293888   ;;  %s673_s18 = sshll.u32 %s1027_s28, 4 }
  0x34   : > { %v350_v26 = vld [vmem:[%s1031_s4 + $0x8] sm:$0xf]  ;;  %vm489_vm12 = vcmask 130048   ;;  %s907_s19 = smov 124   ;;  %s1101_s21 = scalar_lea.vmem [#allocation8], %s673_s18  ;;  %vm495_vm13 = vcmask 261248  }
  0x35   : > { %v1047_v3 = vld.sshfl [vmem:[#allocation1 + $0x10] sm:$0xff pattern:$0x75316420]  ;;  %s908_s22 = smov 112   ;;  %s909_s24 = smov 122   ;;  %vm500_vm14 = vcmask 392448  }
  0x36   : > { %202 = vst [vmem:[#allocation1 + $0x11] ss:$2 sm:$0xff] %v196_v2  ;;  %v185_v4 = vld.sshfl [vmem:[#allocation1] sm:$0xff pattern:$0x75316420]  ;;  %s910_s25 = smov 120  }
  0x37   : > { %v186_v5 = vld.sshfl [vmem:[#allocation1 + $0x8] sm:$0xff pattern:$0x75316420]  ;;  %191 = vst [vmem:[#allocation2] sm:$0xf] %v185_v4  ;;  %s911_s29 = smov 106  }
  0x38   : > { %200 = vst [vmem:[#allocation1 + $0x1] ss:$2 sm:$0xff] %v1043_v1  ;;  %v376_v30 = vld [vmem:[%s1031_s4 + $0x8] sm:$0xf]  ;;  %s912_s30 = smov 104   ;;  %s913_s3 = smov 102  }
  0x39   : > { %192 = vst [vmem:[#allocation2 + $0x8] sm:$0xf] %v186_v5  ;;  %s914_s4 = smov 118   ;;  %vm505_vm15 = vcmask 523648   ;;  %s583_s18 = sshll.u32 %s1101_s21, 4  ;;  %s584_s18 = int_to_ptr.vmem [resolvable:$true] %s583_s18 }
  0x3a   : > { %194 = vst.msk [vmem:[#allocation2 + $0x10] sm:$0xf] %vm193_vm0, %v1047_v3 }
  0x3d   : > { %v1051_v7 = vld.sshfl [vmem:[#allocation1 + $0x10] sm:$0xff pattern:$0x75316420] }
  0x3e   : > { %228 = vst [vmem:[#allocation1 + $0x10] ss:$2 sm:$0xff] %v223_v6 }
  0x3f   : > { %v1053_v8 = vld.sshfl [vmem:[#allocation1] sm:$0xff pattern:$0x75316420]  ;;  %v1055_v9 = vld.sshfl [vmem:[#allocation1 + $0x8] sm:$0xff pattern:$0x75316420] }
  0x40   : > { %226 = vst [vmem:[#allocation1] ss:$2 sm:$0xff] %v1043_v1 }
  0x45   : > { %v231_v11 = vld.sshfl [vmem:[#allocation1 + $0x10] sm:$0xff pattern:$0x75316420] }
  0x46   : > { %236 = vrot.lane.b32.xlu1 %v231_v11, %s899_s15  ;;  %254 = vst [vmem:[#allocation1 + $0x11] ss:$2 sm:$0xff] %v248_v10 }
  0x47   : > { %v230_v12 = vld.sshfl [vmem:[#allocation1 + $0x8] sm:$0xff pattern:$0x75316420]  ;;  %v229_v13 = vld.sshfl [vmem:[#allocation1] sm:$0xff pattern:$0x75316420] }
  0x48   : > { %234 = vrot.lane.b32.xlu0 %v230_v12, %s899_s15  ;;  %252 = vst [vmem:[#allocation1 + $0x1] ss:$2 sm:$0xff] %v1043_v1 }
  0x4d   : > { %v257_v15 = vld.sshfl [vmem:[#allocation1 + $0x10] sm:$0xff pattern:$0x75316420] }
  0x4e   : > { %279 = vst [vmem:[#allocation1 + $0x10] ss:$2 sm:$0xff] %v274_v14  ;;  %232 = vrot.lane.b32.xlu1 %v229_v13, %s899_s15 }
  0x4f   : > { %v255_v16 = vld.sshfl [vmem:[#allocation1] sm:$0xff pattern:$0x75316420]  ;;  %v256_v17 = vld.sshfl [vmem:[#allocation1 + $0x8] sm:$0xff pattern:$0x75316420] }
  0x50   : > { %262 = vrot.lane.b32.xlu0 %v257_v15, %s900_s20  ;;  %260 = vrot.lane.b32.xlu2 %v256_v17, %s900_s20  ;;  %277 = vst [vmem:[#allocation1] ss:$2 sm:$0xff] %v1043_v1 }
  0x55   : > { %v282_v19 = vld.sshfl [vmem:[#allocation1 + $0x10] sm:$0xff pattern:$0x75316420] }
  0x56   : > { %305 = vst [vmem:[#allocation1 + $0x11] ss:$2 sm:$0xff] %v299_v18  ;;  %287 = vrot.lane.b32.xlu1 %v282_v19, %s901_s5 }
  0x57   : > { %v281_v20 = vld.sshfl [vmem:[#allocation1 + $0x8] sm:$0xff pattern:$0x75316420]  ;;  %v280_v21 = vld.sshfl [vmem:[#allocation1] sm:$0xff pattern:$0x75316420] }
  0x58   : > { %285 = vrot.lane.b32.xlu0 %v281_v20, %s901_s5  ;;  %258 = vrot.lane.b32.xlu2 %v255_v16, %s900_s20  ;;  %303 = vst [vmem:[#allocation1 + $0x1] ss:$2 sm:$0xff] %v1043_v1 }
  0x5d   : > { %v308_v23 = vld.sshfl [vmem:[#allocation1 + $0x10] sm:$0xff pattern:$0x75316420] }
  0x5e   : > { %330 = vst [vmem:[#allocation1 + $0x10] ss:$2 sm:$0xff] %v325_v22  ;;  %283 = vrot.lane.b32.xlu1 %v280_v21, %s901_s5  ;;  %s916_s5 = smov 116  }
  0x5f   : > { %v307_v24 = vld.sshfl [vmem:[#allocation1 + $0x8] sm:$0xff pattern:$0x75316420]  ;;  %v306_v25 = vld.sshfl [vmem:[#allocation1] sm:$0xff pattern:$0x75316420] }
  0x60   : > { %313 = vrot.lane.b32.xlu0 %v308_v23, %s902_s6  ;;  %311 = vrot.lane.b32.xlu2 %v307_v24, %s902_s6  ;;  %328 = vst [vmem:[#allocation1] ss:$2 sm:$0xff] %v1043_v1 }
  0x65   : > { %v333_v27 = vld.sshfl [vmem:[#allocation1 + $0x10] sm:$0xff pattern:$0x75316420] }
  0x66   : > { %356 = vst [vmem:[#allocation1 + $0x11] ss:$2 sm:$0xff] %v350_v26  ;;  %v177_v26 = vld [vmem:[#allocation6] sm:$0xff] }
  0x67   : > { %v332_v28 = vld.sshfl [vmem:[#allocation1 + $0x8] sm:$0xff pattern:$0x75316420]  ;;  %v331_v29 = vld.sshfl [vmem:[#allocation1] sm:$0xff pattern:$0x75316420] }
  0x68   : > { %336 = vrot.lane.b32.xlu1 %v332_v28, %s903_s7  ;;  %309 = vrot.lane.b32.xlu2 %v306_v25, %s902_s6  ;;  %354 = vst [vmem:[#allocation1 + $0x1] ss:$2 sm:$0xff] %v1043_v1 }
  0x6d   : > { %v359_v31 = vld.sshfl [vmem:[#allocation1 + $0x10] sm:$0xff pattern:$0x75316420] }
  0x6e   : > { %381 = vst [vmem:[#allocation1 + $0x10] ss:$2 sm:$0xff] %v376_v30  ;;  %364 = vrot.lane.b32.xlu0 %v359_v31, %s904_s8 }
  0x6f   : > { %v357_v32 = vld.sshfl [vmem:[#allocation1] sm:$0xff pattern:$0x75316420]  ;;  %v358_v33 = vld.sshfl [vmem:[#allocation1 + $0x8] sm:$0xff pattern:$0x75316420] }
  0x70   : > { %334 = vrot.lane.b32.xlu1 %v331_v29, %s903_s7  ;;  %338 = vrot.lane.b32.xlu2 %v333_v27, %s903_s7  ;;  %379 = vst [vmem:[#allocation1] ss:$2 sm:$0xff] %v1043_v1  ;;  %s685_s7 = sshll.u32 %s955_s13, 4  ;;  %s570_s13 = scalar_lea.sflag [#allocation5], %s1027_s28 }
  0x75   : > { %v384_v36 = vld.sshfl [vmem:[#allocation1 + $0x10] sm:$0xff pattern:$0x75316420] }
  0x77   : > { %v383_v34 = vld.sshfl [vmem:[#allocation1 + $0x8] sm:$0xff pattern:$0x75316420]  ;;  %v382_v35 = vld.sshfl [vmem:[#allocation1] sm:$0xff pattern:$0x75316420] }
  0x78   : > { %387 = vrot.lane.b32.xlu0 %v383_v34, %s905_s14  ;;  %385 = vrot.lane.b32.xlu1 %v382_v35, %s905_s14 }
  0x79   : > { %362 = vrot.lane.b32.xlu2 %v358_v33, %s904_s8 }
  0x80   : > { %389 = vrot.lane.b32.xlu0 %v384_v36, %s905_s14  ;;  %210 = vrot.lane.b32.xlu1 %v1051_v7, %s906_s17 }
  0x81   : > { %360 = vrot.lane.b32.xlu2 %v357_v32, %s904_s8 }
  0x88   : > { %208 = vrot.lane.b32.xlu0 %v1055_v9, %s906_s17 }
  0x89   : > { %206 = vrot.lane.b32.xlu2 %v1053_v8, %s906_s17  ;;  %s581_s17 = scalar_lea.hbm %s1159_s2, %s685_s7 }
  0xaa   : > { %v261_v37 = vpop.permute.xlu2 %260 }
  0xb2   : > { %v259_v38 = vpop.permute.xlu2 %258 }
  0xb3   : > { %v265_v39 = vsel %vm264_vm1, %v259_v38, %v261_v37 }
  0xb4   : > { %270 = vst [vmem:[#allocation2 + $0x18] sm:$0xf0] %v265_v39 }
  0xb8   : > { %v237_v40 = vpop.permute.xlu1 %236 }
  0xb9   : > { %246 = vst.msk [vmem:[#allocation2 + $0x28] sm:$0xf] %vm193_vm0, %v237_v40 }
  0xba   : > { %v235_v41 = vpop.permute.xlu0 %234  ;;  %v312_v42 = vpop.permute.xlu2 %311 }
  0xbb   : > { %v240_v43 = vsel %vm238_vm2, %v235_v41, %v237_v40 }
  0xbc   : > { %245 = vst [vmem:[#allocation2 + $0x20] sm:$0xf] %v240_v43 }
  0xc0   : > { %v233_v44 = vpop.permute.xlu1 %232 }
  0xc1   : > { %v239_v45 = vsel %vm238_vm2, %v233_v44, %v235_v41  ;;  %vm520_vm2 = vcmask 917248  }
  0xc2   : > { %v263_v46 = vpop.permute.xlu0 %262  ;;  %244 = vst [vmem:[#allocation2 + $0x18] sm:$0xf] %v239_v45  ;;  %v310_v47 = vpop.permute.xlu2 %309 }
  0xc3   : > { %v266_v48 = vsel %vm264_vm1, %v261_v37, %v263_v46  ;;  %272 = vst.msk [vmem:[#allocation2 + $0x28] sm:$0xf0] %vm220_vm3, %v263_v46  ;;  %v316_v49 = vsel %vm315_vm4, %v310_v47, %v312_v42  ;;  %vm515_vm1 = vcmask 786048  }
  0xc4   : > { %271 = vst [vmem:[#allocation2 + $0x20] sm:$0xf0] %v266_v48 }
  0xc5   : > { %321 = vst [vmem:[#allocation2 + $0x30] sm:$0xf0] %v316_v49 }
  0xc8   : > { %v288_v50 = vpop.permute.xlu1 %287 }
  0xc9   : > { %297 = vst.msk [vmem:[#allocation2 + $0x40] sm:$0xf] %vm193_vm0, %v288_v50  ;;  %v403_v13 = vld [vmem:[#allocation2 + $0x18] sm:$0xff] }
  0xca   : > { %v286_v51 = vpop.permute.xlu0 %285  ;;  %v339_v52 = vpop.permute.xlu2 %338  ;;  %v405_v23 = vld [vmem:[#allocation2 + $0x28] sm:$0xff] }
  0xcb   : > { %v291_v53 = vsel %vm289_vm5, %v286_v51, %v288_v50  ;;  %348 = vst.msk [vmem:[#allocation2 + $0x58] sm:$0xf] %vm193_vm0, %v339_v52  ;;  %v404_v25 = vld [vmem:[#allocation2 + $0x20] sm:$0xff] }
  0xcc   : > { %296 = vst [vmem:[#allocation2 + $0x38] sm:$0xf] %v291_v53 }
  0xd0   : > { %v284_v54 = vpop.permute.xlu1 %283 }
  0xd1   : > { %v290_v55 = vsel %vm289_vm5, %v284_v54, %v286_v51  ;;  %vm527_vm5 = vcmask 932864  }
  0xd2   : > { %v314_v56 = vpop.permute.xlu0 %313  ;;  %295 = vst [vmem:[#allocation2 + $0x30] sm:$0xf] %v290_v55 }
  0xd3   : > { %v317_v57 = vsel %vm315_vm4, %v312_v42, %v314_v56  ;;  %323 = vst.msk [vmem:[#allocation2 + $0x40] sm:$0xf0] %vm220_vm3, %v314_v56  ;;  %v363_v58 = vpop.permute.xlu2 %362  ;;  %vm530_vm4 = vcmask 1048448  }
  0xd4   : > { %322 = vst [vmem:[#allocation2 + $0x38] sm:$0xf0] %v317_v57 }
  0xd9   : > { %v406_v11 = vld [vmem:[#allocation2 + $0x30] sm:$0xff] }
  0xda   : > { %v337_v59 = vpop.permute.xlu1 %336  ;;  %v408_v21 = vld [vmem:[#allocation2 + $0x40] sm:$0xff] }
  0xdb   : > { %v342_v60 = vsel %vm340_vm6, %v337_v59, %v339_v52  ;;  %v361_v61 = vpop.permute.xlu2 %360  ;;  %v407_v22 = vld [vmem:[#allocation2 + $0x38] sm:$0xff] }
  0xdc   : > { %347 = vst [vmem:[#allocation2 + $0x50] sm:$0xf] %v342_v60  ;;  %v367_v62 = vsel %vm366_vm7, %v361_v61, %v363_v58 }
  0xdd   : > { %372 = vst [vmem:[#allocation2 + $0x48] sm:$0xf0] %v367_v62 }
  0xe0   : > { %v365_v63 = vpop.permute.xlu0 %364 }
  0xe1   : > { %v368_v0 = vsel %vm366_vm7, %v363_v58, %v365_v63  ;;  %374 = vst.msk [vmem:[#allocation2 + $0x58] sm:$0xf0] %vm220_vm3, %v365_v63 }
  0xe2   : > { %373 = vst [vmem:[#allocation2 + $0x50] sm:$0xf0] %v368_v0  ;;  %v335_v1 = vpop.permute.xlu1 %334 }
  0xe3   : > { %v341_v2 = vsel %vm340_vm6, %v335_v1, %v337_v59  ;;  %v207_v12 = vpop.permute.xlu2 %206 }
  0xe4   : > { %346 = vst [vmem:[#allocation2 + $0x48] sm:$0xf] %v341_v2 }
  0xe8   : > { %v411_v19 = vld [vmem:[#allocation2 + $0x58] sm:$0xff] }
  0xe9   : > { %v410_v20 = vld [vmem:[#allocation2 + $0x50] sm:$0xff] }
  0xea   : > { %v388_v3 = vpop.permute.xlu0 %387  ;;  %v386_v4 = vpop.permute.xlu1 %385 }
  0xeb   : > { %v392_v5 = vsel %vm391_vm8, %v386_v4, %v388_v3  ;;  %v409_v10 = vld [vmem:[#allocation2 + $0x48] sm:$0xff] }
  0xec   : > { %397 = vst [vmem:[#allocation2 + $0x60] sm:$0xf] %v392_v5 }
  0xf2   : > { %v390_v6 = vpop.permute.xlu0 %389  ;;  %v211_v9 = vpop.permute.xlu1 %210 }
  0xf3   : > { %v393_v7 = vsel %vm391_vm8, %v388_v3, %v390_v6  ;;  %399 = vst.msk [vmem:[#allocation2 + $0x70] sm:$0xf] %vm193_vm0, %v390_v6  ;;  %v412_v8 = vld [vmem:[#allocation2 + $0x60] sm:$0xf]  ;;  %vm510_vm0 = vcmask 654848  }
  0xf4   : > { %398 = vst [vmem:[#allocation2 + $0x68] sm:$0xf] %v393_v7  ;;  %674 = vmatpush.msk.msra.mxu0 %vm419_vm9, %v412_v8 }
  0xf5   : > { %221 = vst.msk [vmem:[#allocation2 + $0x10] sm:$0xf0] %vm220_vm3, %v211_v9  ;;  %vm561_vm3 = vcmask 818176  }
  0xf6   : > { %441 = vmatpush.msra.mxu0 %v409_v10 }
  0xf8   : > { %442 = vmatpush.msra.mxu0 %v406_v11 }
  0xfa   : > { %v209_v14 = vpop.permute.xlu0 %208  ;;  %443 = vmatpush.msra.mxu0 %v403_v13  ;;  %v414_v15 = vld [vmem:[#allocation2 + $0x70] sm:$0xf] }
  0xfb   : > { %v213_v16 = vsel %vm212_vm10, %v207_v12, %v209_v14  ;;  %v214_v17 = vsel %vm212_vm10, %v209_v14, %v211_v9  ;;  %678 = vmatpush.msk.msra.mxu2 %vm419_vm9, %v414_v15  ;;  %v413_v18 = vld [vmem:[#allocation2 + $0x68] sm:$0xf] }
  0xfc   : > { %218 = vst [vmem:[#allocation2] sm:$0xf0] %v213_v16  ;;  %676 = vmatpush.msk.msra.mxu1 %vm419_vm9, %v413_v18  ;;  %v402_v24 = vld [vmem:[#allocation2 + $0x10] sm:$0xff] }
  0xfd   : > { %219 = vst [vmem:[#allocation2 + $0x8] sm:$0xf0] %v214_v17  ;;  %481 = vmatpush.msra.mxu2 %v411_v19 }
  0xfe   : > { %461 = vmatpush.msra.mxu1 %v410_v20 }
  0xff   : > { %482 = vmatpush.msra.mxu2 %v408_v21 }
 0x100   : > { %462 = vmatpush.msra.mxu1 %v407_v22 }
 0x101   : > { %483 = vmatpush.msra.mxu2 %v405_v23 }
 0x102   : > { %463 = vmatpush.msra.mxu1 %v404_v25 }
 0x103   : > { %v400_v27 = vld [vmem:[#allocation2] sm:$0xff]  ;;  %484 = vmatpush.msra.mxu2 %v402_v24 }
 0x104   : > { %444 = vmatpush.msra.mxu0 %v400_v27  ;;  %v401_v28 = vld [vmem:[#allocation2 + $0x8] sm:$0xff]  ;;  %679 = vmatmul.msk.f32.vlgmr.msra.gmra.mxu2 %vm415_vm11, %v177_v26 }
 0x105   : > { %464 = vmatpush.msra.mxu1 %v401_v28  ;;  %675 = vmatmul.msk.f32.vlgmr.msra.gmra.mxu0 %vm415_vm11, %v177_v26 }
 0x106   : > { %677 = vmatmul.msk.f32.vlgmr.msra.gmra.mxu1 %vm415_vm11, %v177_v26 }
 0x182   : > { %v446_v29 = vpop.f32.mrf.mxu0 }
 0x183   : > { %v466_v30 = vpop.f32.mrf.mxu1  ;;  %497 = vrot.lane.b32.xlu1 %v446_v29, %s907_s19  ;;  %492 = vrot.lane.b32.xlu0 %v446_v29, %s899_s15  ;;  %490 = vst.msk [vmem:[%s1101_s21] sm:$0xff] %vm489_vm12, %v446_v29  ;;  %s915_s15 = smov 100   ;;  %s585_s19 = sshll.u32 %s581_s17, 4  ;;  %s586_s19 = int_to_ptr.hbm [resolvable:$true] %s585_s19 }
 0x184   : > { %532 = vrot.lane.b32.xlu2 %v466_v30, %s908_s22  ;;  %s840_s22 = sshra.s32 %s586_s19, 4  ;;  %s841_s22 = int_to_ptr.hbm [resolvable:$true] %s840_s22 }
 0x185   : > { %p847_p9 = scmp.lt.s32.totalorder %s841_s22, %s1159_s2 }
 0x187   : > { %v486_v31 = vpop.f32.mrf.mxu2 }
 0x18b   : > { %540 = vrot.lane.b32.xlu1 %v466_v30, %s902_s6  ;;  %536 = vrot.lane.b32.xlu0 %v466_v30, %s900_s20  ;;  %s917_s20 = smov 114   ;;  %s918_s6 = smov 98  }
 0x18c   : > { %502 = vrot.lane.b32.xlu2 %v446_v29, %s909_s24  ;;  %s842_s24 = scalar_lea.hbm %s841_s22, 16 }
 0x18d   : > { %p843_p1 = scmp.ne.s32.totalorder %s841_s22, %s842_s24 }
 0x18f   : > { %p844_p4 = pnand %p843_p1, %p1001_p7 }
 0x191   : > { %p845_p8 = pneg %p844_p4 }
 0x193   : > { %507 = vrot.lane.b32.xlu1 %v446_v29, %s910_s25  ;;  %544 = vrot.lane.b32.xlu0 %v466_v30, %s911_s29 }
 0x194   : > { %548 = vrot.lane.b32.xlu2 %v466_v30, %s912_s30  ;;  %s846_s30 = scalar_lea.hbm %s1159_s2, 32 }
 0x195   : > { %p848_p10 = scmp.lt.s32.totalorder %s846_s30, %s842_s24 }
 0x197   : > { %p849_p2 = por %p848_p10, %p847_p9 }
 0x199   : > { %p850_p11 = pnand %p849_p2, %p845_p8 }
 0x19b   : > { %552 = vrot.lane.b32.xlu1 %v466_v30, %s913_s3  ;;  %512 = vrot.lane.b32.xlu0 %v446_v29, %s914_s4 }
 0x19c   : > { %557 = vrot.lane.b32.xlu2 %v466_v30, %s915_s15 }
 0x1a3   : > { %517 = vrot.lane.b32.xlu1 %v446_v29, %s916_s5  ;;  %559 = vrot.lane.b32.xlu0 %v486_v31, %s915_s15 }
 0x1a4   : > { %523 = vrot.lane.b32.xlu2 %v446_v29, %s917_s20 }
 0x1ab   : > { %565 = vrot.lane.b32.xlu1 %v486_v31, %s918_s6  ;;  %525 = vrot.lane.b32.xlu0 %v466_v30, %s917_s20 }
 0x1de   : > { %v533_v32 = vpop.permute.xlu2 %532 }
 0x1df   : > { %535 = vst.msk [vmem:[%s1101_s21 + $0x8] sm:$0xff] %vm489_vm12, %v533_v32 }
 0x1e6   : > { %v503_v35 = vpop.permute.xlu2 %502 }
 0x1ee   : > { %v549_v40 = vpop.permute.xlu2 %548 }
 0x1f5   : > { %v498_v33 = vpop.permute.xlu1 %497  ;;  %v493_v34 = vpop.permute.xlu0 %492 }
 0x1f6   : > { %496 = vst.msk [vmem:[%s1101_s21] sm:$0xff] %vm495_vm13, %v493_v34  ;;  %v558_v43 = vpop.permute.xlu2 %557 }
 0x1f7   : > { %501 = vst.msk [vmem:[%s1101_s21] sm:$0xff] %vm500_vm14, %v498_v33 }
 0x1f8   : > { %506 = vst.msk [vmem:[%s1101_s21] sm:$0xff] %vm505_vm15, %v503_v35 }
 0x1fd   : > { %v541_v36 = vpop.permute.xlu1 %540  ;;  %v537_v37 = vpop.permute.xlu0 %536 }
 0x1fe   : > { %539 = vst.msk [vmem:[%s1101_s21 + $0x8] sm:$0xff] %vm495_vm13, %v537_v37  ;;  %v524_v47 = vpop.permute.xlu2 %523 }
 0x1ff   : > { %543 = vst.msk [vmem:[%s1101_s21 + $0x8] sm:$0xff] %vm500_vm14, %v541_v36 }
 0x205   : > { %v508_v38 = vpop.permute.xlu1 %507  ;;  %v545_v39 = vpop.permute.xlu0 %544 }
 0x206   : > { %511 = vst.msk [vmem:[%s1101_s21] sm:$0xff] %vm510_vm0, %v508_v38 }
 0x207   : > { %547 = vst.msk [vmem:[%s1101_s21 + $0x8] sm:$0xff] %vm505_vm15, %v545_v39 }
 0x208   : > { %551 = vst.msk [vmem:[%s1101_s21 + $0x8] sm:$0xff] %vm510_vm0, %v549_v40 }
 0x20d   : > { %v553_v41 = vpop.permute.xlu1 %552  ;;  %v513_v42 = vpop.permute.xlu0 %512 }
 0x20e   : > { %555 = vst.msk [vmem:[%s1101_s21 + $0x8] sm:$0xff] %vm515_vm1, %v553_v41 }
 0x20f   : > { %516 = vst.msk [vmem:[%s1101_s21] sm:$0xff] %vm515_vm1, %v513_v42 }
 0x215   : > { %v518_v44 = vpop.permute.xlu1 %517  ;;  %v560_v45 = vpop.permute.xlu0 %559 }
 0x216   : > { %521 = vst.msk [vmem:[%s1101_s21] sm:$0xff] %vm520_vm2, %v518_v44  ;;  %v562_v46 = vsel %vm561_vm3, %v558_v43, %v560_v45 }
 0x217   : > { %564 = vst.msk [vmem:[%s1101_s21 + $0x8] sm:$0xff] %vm520_vm2, %v562_v46 }
 0x21d   : > { %v566_v48 = vpop.permute.xlu1 %565  ;;  %v526_v49 = vpop.permute.xlu0 %525 }
 0x21e   : > { %568 = vst.msk [vmem:[%s1101_s21 + $0x8] sm:$0xff] %vm530_vm4, %v566_v48  ;;  %v528_v50 = vsel %vm527_vm5, %v524_v47, %v526_v49 }
 0x21f   : > { %531 = vst.msk [vmem:[%s1101_s21] sm:$0xff] %vm530_vm4, %v528_v50 }
 0x220   : > { %853 = shalt.err (!%p850_p11)
}
 0x221   : > { %695 = dma.vmem_to_hbm [thread:$0]  (%p1001_p7), %s584_s18, 256, %s586_s19, %s570_s13  }
 0x222 PF: > { %s597_s28 = sand.u32 1, %s884_s9   ;;  %p1165_p12 = scmp.ge.s32.totalorder %s896_s12, 2 }
 0x223   : > { %s598_s21 = scalar_lea.sflag [#allocation5], %s597_s28 }
 0x224   : > { %p706_p13 = pnand %p1165_p12, %p969_p6 }
 0x226   : > { %p707_p0 = pneg %p706_p13 }
 0x228   : > { %879 = dma.done.wait (%p707_p0), %s598_s21, 256  }
 0x229   : > { %881 = vsyncadd (%p707_p0), %s598_s21, 4294967040  ;;  %p16_p3 = scmp.ge.s32.totalorder %s987_s23, 4   ;;  %s1166_s9 = smov %s888_s10 }
 0x22a   : > { %s1167_s10 = smov %s892_s11  ;;  %s1168_s11 = smov %s997_s26 }
 0x22b   : > { %s1169_s12 = smov %s987_s23  ;;  %18 = sbr.rel (!%p16_p3) target bundleno = 6 (0x6), region = 90 }
 0x230   :  { %604 = vsyncpa [#allocation4], 1 }
 0x231   :  { %606 = vsyncpa [#allocation4 + $0x1], 1 }
 0x232   :  { %607 = vsyncpa [#allocation7], 1 }
 0x233   :  { %608 = vsyncpa [#allocation5], 1 }
 0x234   :  { %610 = vsyncpa [#allocation5 + $0x1], 1 }

</bundles_post_ra>
